<compile_context>
chip_gen: v7x
topology: tpu7x:2x2x1
jax: 0.10.0
libtpu: 0.0.40
codegen_flags: <defaults>
</compile_context>

<pallas_src>
import functools

import jax
import jax.numpy as jnp
from jax.experimental import pallas as pl
from jax.experimental.pallas import tpu as pltpu

LANE = 128


def _round_up(x, m):
    return (x + m - 1) // m * m


def _row_tile(n, max_tile=256):
    """Largest multiple-of-16 row tile <= max_tile that divides n (else n).

    max_tile=256 keeps 2x double-buffered bf16 adj tiles comfortably inside
    the default scoped-VMEM limit even on v7x (64 MiB physical / 32 MiB scoped)
    at realistic graph sizes.
    """
    if n <= max_tile:
        return n
    for t in range(max_tile, 15, -16):
        if n % t == 0:
            return t
    return n  # fallback: single block (only hit for awkward N)


# --------------------- support = X @ W (lane-padded) -------------------------

def _xw_kernel(x_ref, w_ref, o_ref):
    o_ref[...] = jnp.dot(
        x_ref[...], w_ref[...], preferred_element_type=jnp.float32
    ).astype(o_ref.dtype)


def compute_support(x_pad, w_pad, *, out_dtype=jnp.bfloat16):
    """(N, F_in_pad) @ (F_in_pad, F_out_pad) -> (N, F_out_pad), bf16 output."""
    n, f_in = x_pad.shape
    f_out = w_pad.shape[1]
    tm = _row_tile(n)
    return pl.pallas_call(
        _xw_kernel,
        out_shape=jax.ShapeDtypeStruct((n, f_out), out_dtype),
        grid=(n // tm,),
        in_specs=[
            pl.BlockSpec((tm, f_in), lambda i: (i, 0)),     # streamed x rows
            pl.BlockSpec((f_in, f_out), lambda i: (0, 0)),  # resident W
        ],
        out_specs=pl.BlockSpec((tm, f_out), lambda i: (i, 0)),
        compiler_params=pltpu.CompilerParams(
            dimension_semantics=("parallel",)),
    )(x_pad, w_pad)


# ------------- out = adj @ support + bias (+relu), row-streamed --------------

def _adj_kernel(adj_ref, s_ref, b_ref, o_ref, *, apply_relu):
    # adj row-tile (bf16) @ resident support (bf16) on the MXU, f32 accumulate.
    acc = jnp.dot(adj_ref[...], s_ref[...], preferred_element_type=jnp.float32)
    acc = acc + b_ref[...]                      # VPU bias broadcast
    if apply_relu:
        acc = jnp.maximum(acc, 0.0)
    o_ref[...] = acc.astype(o_ref.dtype)


def adj_matmul(adj_bf, support, bias2d, *, apply_relu, out_dtype=jnp.float32):
    n = adj_bf.shape[0]
    f_out = support.shape[1]
    tm = _row_tile(n)
    kernel = functools.partial(_adj_kernel, apply_relu=apply_relu)
    return pl.pallas_call(
        kernel,
        out_shape=jax.ShapeDtypeStruct((n, f_out), out_dtype),
        grid=(n // tm,),
        in_specs=[
            pl.BlockSpec((tm, n), lambda i: (i, 0)),       # streamed adj rows
            pl.BlockSpec((n, f_out), lambda i: (0, 0)),    # resident support
            pl.BlockSpec((1, f_out), lambda i: (0, 0)),    # resident bias
        ],
        out_specs=pl.BlockSpec((tm, f_out), lambda i: (i, 0)),
        compiler_params=pltpu.CompilerParams(
            dimension_semantics=("parallel",)),            # megacore on v7x
    )(adj_bf, support, bias2d)


# ------------------------------- full forward --------------------------------

def gcn_forward(x, adj, params, dropout_rate):
    """GCN forward (inference). dropout(training=False) is identity."""
    w1, b1, w2, b2 = params
    n, nfeat = x.shape
    nhid = w1.shape[1]
    nout = w2.shape[1]

    f_in_p = _round_up(nfeat, LANE)
    f_hid_p = _round_up(nhid, LANE)
    f_out_p = _round_up(nout, LANE)

    # Zero-pad feature dims to 128 lanes (lane-dense stores / MXU columns).
    x_p = jnp.pad(x.astype(jnp.float32), ((0, 0), (0, f_in_p - nfeat)))
    w1_p = jnp.pad(w1, ((0, f_in_p - nfeat), (0, f_hid_p - nhid)))
    b1_p = jnp.pad(b1, (0, f_hid_p - nhid)).reshape(1, f_hid_p)
    w2_p = jnp.pad(w2, ((0, f_hid_p - nhid), (0, f_out_p - nout)))
    b2_p = jnp.pad(b2, (0, f_out_p - nout)).reshape(1, f_out_p)

    # Cast the dominant HBM stream once to bf16 (f32 MXU accumulation inside).
    adj_bf = adj.astype(jnp.bfloat16)

    # Layer 1: h = relu(adj @ (x @ W1) + b1)
    s1 = compute_support(x_p, w1_p)                       # (n, f_hid_p) bf16
    h = adj_matmul(adj_bf, s1, b1_p, apply_relu=True)     # (n, f_hid_p) f32
    # TODO(synk): dropout is identity at inference (training=False); not applied.
    del dropout_rate

    # Layer 2: out = adj @ (h @ W2) + b2
    s2 = compute_support(h, w2_p)                         # (n, f_out_p) bf16
    out_p = adj_matmul(adj_bf, s2, b2_p, apply_relu=False)

    return out_p[:, :nout]


def init_gcn_params(key, nfeat, nhid, nout):
    """Deterministic init mimicking Kipf's GraphConvolution.reset_parameters
    (uniform in [-1/sqrt(out), 1/sqrt(out)])."""
    k1, k2, k3, k4 = jax.random.split(key, 4)
    std1 = 1.0 / jnp.sqrt(nhid)
    std2 = 1.0 / jnp.sqrt(nout)
    w1 = jax.random.uniform(k1, (nfeat, nhid), jnp.float32, -std1, std1)
    b1 = jax.random.uniform(k2, (nhid,), jnp.float32, -std1, std1)
    w2 = jax.random.uniform(k3, (nhid, nout), jnp.float32, -std2, std2)
    b2 = jax.random.uniform(k4, (nout,), jnp.float32, -std2, std2)
    return w1, b1, w2, b2


if __name__ == "__main__":
    # Small, module-consistent shapes: N nodes with nfeat input features.
    N, NFEAT, NHID, NOUT = 64, 32, 32, 16
    DROPOUT = 0.5

    key = jax.random.PRNGKey(0)
    kx, kadj, kparams = jax.random.split(key, 3)

    x = jax.random.normal(kx, (N, NFEAT), jnp.float32)

    # Symmetric row-normalized adjacency with self-loops (typical GCN input).
    a = (jax.random.uniform(kadj, (N, N)) < 0.1).astype(jnp.float32)
    a = jnp.maximum(a, a.T) + jnp.eye(N, dtype=jnp.float32)
    deg = jnp.sum(a, axis=1, keepdims=True)
    adj = a / deg

    params = init_gcn_params(kparams, NFEAT, NHID, NOUT)

    out = jax.block_until_ready(gcn_forward(x, adj, params, DROPOUT))

    # Plain-JAX reference mimicking the kernel's precision choices
    # (bf16 adjacency and bf16 support, f32 accumulation).
    w1, b1, w2, b2 = params
    hi = jax.lax.Precision.HIGHEST
    adj_bf = adj.astype(jnp.bfloat16).astype(jnp.float32)
    s1 = jnp.matmul(x, w1, precision=hi).astype(jnp.bfloat16).astype(jnp.float32)
    h_ref = jnp.maximum(jnp.matmul(adj_bf, s1, precision=hi) + b1, 0.0)
    s2 = jnp.matmul(h_ref, w2, precision=hi).astype(jnp.bfloat16).astype(jnp.float32)
    ref = jnp.matmul(adj_bf, s2, precision=hi) + b2

    assert out.shape == (N, NOUT)
    assert jnp.allclose(out, ref, atol=2e-2, rtol=2e-2), (
        float(jnp.max(jnp.abs(out - ref))))

    print("KERNEL_OK")
</pallas_src>

<mosaic_0001>
module attributes {stable_mosaic.version = 11 : i64} {
  func.func @_xw_kernel(%arg0: i32, %arg1: memref<64x128xf32, #tpu.memory_space<vmem>>, %arg2: memref<128x128xf32, #tpu.memory_space<vmem>>, %arg3: memref<64x128xbf16, #tpu.memory_space<vmem>>) attributes {dimension_semantics = [#tpu.dimension_semantics<parallel>], iteration_bounds = array<i64: 1>, scalar_prefetch = 0 : i64, scratch_operands = 0 : i64, tpu.core_type = #tpu.core_type<tc>, window_params = [{transform_indices = @transform_0, window_bounds = array<i64: 64, 128>}, {pipeline_mode = #tpu.pipeline_mode<synchronous>, transform_indices = @transform_1, window_bounds = array<i64: 128, 128>}, {transform_indices = @transform_2, window_bounds = array<i64: 64, 128>}]} {
    %c0 = arith.constant 0 : index
    %c0_0 = arith.constant 0 : index
    %0 = vector.load %arg1[%c0, %c0_0] : memref<64x128xf32, #tpu.memory_space<vmem>>, vector<64x128xf32>
    %c0_1 = arith.constant 0 : index
    %c0_2 = arith.constant 0 : index
    %1 = vector.load %arg2[%c0_1, %c0_2] : memref<128x128xf32, #tpu.memory_space<vmem>>, vector<128x128xf32>
    %cst = arith.constant dense<0.000000e+00> : vector<64x128xf32>
    %2 = tpu.matmul %0, %1, %cst {dimension_numbers = #tpu.dot_dimension_numbers<[1], [0], [0], [1], [0, 0, 1, 1], [], []>} : vector<64x128xf32>, vector<128x128xf32>, vector<64x128xf32> -> vector<64x128xf32>
    %3 = arith.truncf %2 : vector<64x128xf32> to vector<64x128xbf16>
    %c0_3 = arith.constant 0 : index
    %c0_4 = arith.constant 0 : index
    %4 = vector.load %arg3[%c0_3, %c0_4] : memref<64x128xbf16, #tpu.memory_space<vmem>>, vector<64x128xbf16>
    tpu.vector_store %arg3[%c0_3, %c0_4], %3 {strides = array<i32>} : memref<64x128xbf16, #tpu.memory_space<vmem>>, vector<64x128xbf16>,
    return
  }
  func.func @transform_0(%arg0: i32) -> (i32, i32) {
    %c0_i32 = arith.constant 0 : i32
    %c0_i32_0 = arith.constant 0 : i32
    return %arg0, %c0_i32 : i32, i32
  }
  func.func @transform_1(%arg0: i32) -> (i32, i32) {
    %c0_i32 = arith.constant 0 : i32
    %c0_i32_0 = arith.constant 0 : i32
    %c0_i32_1 = arith.constant 0 : i32
    return %c0_i32, %c0_i32_0 : i32, i32
  }
  func.func @transform_2(%arg0: i32) -> (i32, i32) {
    %c0_i32 = arith.constant 0 : i32
    %c0_i32_0 = arith.constant 0 : i32
    return %arg0, %c0_i32 : i32, i32
  }
}

</mosaic_0001>

<bundles_post_ra>
// kernel: tpu_custom_call.1
= control target key start
LH: loop header
LB: loop body
LE: loop exit
PB: predicated region body
PF: predicated region fallthrough
CT: control target
= control target key end

     0   :  { %7 = vsyncpa [#allocation3], 0  ;;  %s519_s0 = inlined_call_operand.hbm [shape: f32[64,128], index: 0, kind: input, shape index: {}]   ;;  %s520_s1 = inlined_call_operand.hbm [shape: f32[128,128], index: 1, kind: input, shape index: {}]   ;;  %s521_s2 = inlined_call_operand.hbm [shape: bf16[64,128], index: 2, kind: output, shape index: {}]  }
   0x1   :  { %8 = vsyncpa [#allocation6], 0 }
   0x2   :  { %9 = vsyncpa [#allocation4], 0  ;;  %s461_s9 = smov [#allocation2]   ;;  %s389_s13 = scalar_lea.hbm %s519_s0, 1024 }
   0x3   :  { %s15_s10 = sshll.u32 %s461_s9, 4  ;;  %p390_p0 = scmp.ne.s32.totalorder %s519_s0, %s389_s13  ;;  %s16_s10 = int_to_ptr.vmem [resolvable:$true] %s15_s10 }
   0x4   :  { %p393_p1 = scmp.lt.u32.totalorder %s389_s13, %s519_s0 }
   0x6   :  { %p395_p2 = pnand %p393_p1, %p390_p0 }
   0x8   :  { %398 = shalt.err (!%p395_p2)
}
   0x9   :  { %s399_s18 = scalar_lea.vmem %s16_s10, 1024  ;;  %p404_p4 = scmp.lt.s32.totalorder %s16_s10, %s16_s10 }
   0xa   :  { %p400_p3 = scmp.ne.s32.totalorder %s16_s10, %s399_s18  ;;  %p405_p5 = scmp.lt.s32.totalorder %s399_s18, %s399_s18 }
   0xc   :  { %p406_p6 = por %p405_p5, %p404_p4 }
   0xe   :  { %p407_p7 = pnand %p406_p6, %p400_p3 }
  0x10   :  { %410 = shalt.err (!%p407_p7)
}
  0x11   :  { %s462_s19 = smov 128   ;;  %s463_s20 = smov 8  }
  0x12   :  { %21 = dma.hbm_to_vmem [thread:$0]  %s519_s0, 1024, %s16_s10, [#allocation3], %s462_s19, %s462_s19, %s463_s20  }
  0x13   :  { %s464_s23 = smov [#allocation5]   ;;  %s411_s27 = scalar_lea.hbm %s520_s1, 2048 }
  0x14   :  { %s27_s24 = sshll.u32 %s464_s23, 4  ;;  %p412_p8 = scmp.ne.s32.totalorder %s520_s1, %s411_s27  ;;  %s28_s24 = int_to_ptr.vmem [resolvable:$true] %s27_s24 }
  0x15   :  { %p415_p9 = scmp.lt.u32.totalorder %s411_s27, %s520_s1 }
  0x17   :  { %p417_p10 = pnand %p415_p9, %p412_p8 }
  0x19   :  { %420 = shalt.err (!%p417_p10)
}
  0x1a   :  { %s421_s4 = scalar_lea.vmem %s28_s24, 2048  ;;  %p426_p12 = scmp.lt.s32.totalorder %s28_s24, %s28_s24 }
  0x1b   :  { %p422_p11 = scmp.ne.s32.totalorder %s28_s24, %s421_s4  ;;  %p427_p13 = scmp.lt.s32.totalorder %s421_s4, %s421_s4 }
  0x1d   :  { %p428_p0 = por %p427_p13, %p426_p12 }
  0x1f   :  { %p429_p1 = pnand %p428_p0, %p422_p11 }
  0x21   :  { %432 = shalt.err (!%p429_p1)
}
  0x22   :  { %33 = dma.hbm_to_vmem [thread:$0]  %s520_s1, 2048, %s28_s24, [#allocation6], %s462_s19, %s462_s19, %s463_s20  }
  0x23   :  { %455 = dma.done.wait [#allocation3], 1024  }
  0x24   :  { %456 = vsyncadd [#allocation3], 4294966272 }
  0x25   :  { %457 = dma.done.wait [#allocation6], 2048  }
  0x26   :  { %458 = vsyncadd [#allocation6], 4294965248  ;;  %v48_v0 = vld [vmem:[#allocation5] sm:$0xff]  ;;  %v49_v1 = vld [vmem:[#allocation5 + $0x8] sm:$0xff]  ;;  %s465_s1 = smov [#allocation7]  }
  0x27   :  { %v50_v2 = vld [vmem:[#allocation5 + $0x10] sm:$0xff]  ;;  %v334_v3 = vpack.c.bf16 %v49_v1, %v48_v0  ;;  %v51_v4 = vld [vmem:[#allocation5 + $0x18] sm:$0xff]  ;;  %v52_v6 = vld [vmem:[#allocation5 + $0x20] sm:$0xff]  ;;  %s214_s6 = sshll.u32 %s465_s1, 4  ;;  %s215_s6 = int_to_ptr.vmem [resolvable:$true] %s214_s6 }
  0x28   :  { %v338_v5 = vpack.c.bf16 %v51_v4, %v50_v2  ;;  %v53_v7 = vld [vmem:[#allocation5 + $0x28] sm:$0xff]  ;;  %v40_v9 = vld [vmem:[#allocation2] sm:$0xff]  ;;  %v54_v11 = vld [vmem:[#allocation5 + $0x30] sm:$0xff]  ;;  %s433_s7 = scalar_lea.vmem %s215_s6, 512  ;;  %p438_p3 = scmp.lt.s32.totalorder %s215_s6, %s215_s6 }
  0x29   :  { %335 = vmatprep.subr.bf16.mxu0 %v334_v3  ;;  %366 = vmatprep.subr.bf16.mxu1 %v334_v3  ;;  %v342_v8 = vpack.c.bf16 %v53_v7, %v52_v6  ;;  %v44_v10 = vld [vmem:[#allocation2 + $0x20] sm:$0xff]  ;;  %v55_v12 = vld [vmem:[#allocation5 + $0x38] sm:$0xff]  ;;  %v57_v15 = vld [vmem:[#allocation5 + $0x48] sm:$0xff]  ;;  %p434_p2 = scmp.ne.s32.totalorder %s215_s6, %s433_s7  ;;  %p439_p4 = scmp.lt.s32.totalorder %s433_s7, %s433_s7 }
  0x2a   :  { %337 = vmatpush3.bf16.msra.mxu0 %v334_v3  ;;  %374 = vmatpush3.bf16.msra.mxu1 %v334_v3  ;;  %v346_v13 = vpack.c.bf16 %v55_v12, %v54_v11  ;;  %v56_v14 = vld [vmem:[#allocation5 + $0x40] sm:$0xff]  ;;  %v58_v17 = vld [vmem:[#allocation5 + $0x50] sm:$0xff]  ;;  %v59_v18 = vld [vmem:[#allocation5 + $0x58] sm:$0xff] }
  0x2b   :  { %339 = vmatprep.subr.bf16.mxu0 %v338_v5  ;;  %367 = vmatprep.subr.bf16.mxu1 %v338_v5  ;;  %v350_v16 = vpack.c.bf16 %v57_v15, %v56_v14  ;;  %v354_v19 = vpack.c.bf16 %v59_v18, %v58_v17  ;;  %v60_v20 = vld [vmem:[#allocation5 + $0x60] sm:$0xff]  ;;  %v61_v21 = vld [vmem:[#allocation5 + $0x68] sm:$0xff]  ;;  %v62_v23 = vld [vmem:[#allocation5 + $0x70] sm:$0xff]  ;;  %p440_p5 = por %p439_p4, %p438_p3 }
  0x2c   :  { %322 = vmatprep.mubr.f32.mxu0 %v40_v9  ;;  %328 = vmatprep.mubr.f32.mxu1 %v44_v10  ;;  %v358_v22 = vpack.c.bf16 %v61_v21, %v60_v20  ;;  %v63_v24 = vld [vmem:[#allocation5 + $0x78] sm:$0xff]  ;;  %v41_v26 = vld [vmem:[#allocation2 + $0x8] sm:$0xff]  ;;  %v42_v28 = vld [vmem:[#allocation2 + $0x10] sm:$0xff] }
  0x2d   :  { %v362_v25 = vpack.c.bf16 %v63_v24, %v62_v23  ;;  %v45_v27 = vld [vmem:[#allocation2 + $0x28] sm:$0xff]  ;;  %v46_v29 = vld [vmem:[#allocation2 + $0x30] sm:$0xff]  ;;  %v43_v30 = vld [vmem:[#allocation2 + $0x18] sm:$0xff]  ;;  %p441_p6 = pnand %p440_p5, %p434_p2 }
  0x2e   :  { %341 = vmatpush3.bf16.msra.mxu0 %v338_v5  ;;  %375 = vmatpush3.bf16.msra.mxu1 %v338_v5  ;;  %v47_v31 = vld [vmem:[#allocation2 + $0x38] sm:$0xff] }
  0x2f   :  { %343 = vmatprep.subr.bf16.mxu0 %v342_v8  ;;  %368 = vmatprep.subr.bf16.mxu1 %v342_v8 }
  0x32   :  { %345 = vmatpush3.bf16.msra.mxu0 %v342_v8  ;;  %376 = vmatpush3.bf16.msra.mxu1 %v342_v8 }
  0x33   :  { %347 = vmatprep.subr.bf16.mxu0 %v346_v13  ;;  %369 = vmatprep.subr.bf16.mxu1 %v346_v13 }
  0x36   :  { %349 = vmatpush3.bf16.msra.mxu0 %v346_v13  ;;  %377 = vmatpush3.bf16.msra.mxu1 %v346_v13 }
  0x37   :  { %351 = vmatprep.subr.bf16.mxu0 %v350_v16  ;;  %370 = vmatprep.subr.bf16.mxu1 %v350_v16 }
  0x3a   :  { %353 = vmatpush3.bf16.msra.mxu0 %v350_v16  ;;  %378 = vmatpush3.bf16.msra.mxu1 %v350_v16 }
  0x3b   :  { %355 = vmatprep.subr.bf16.mxu0 %v354_v19  ;;  %371 = vmatprep.subr.bf16.mxu1 %v354_v19 }
  0x3e   :  { %357 = vmatpush3.bf16.msra.mxu0 %v354_v19  ;;  %379 = vmatpush3.bf16.msra.mxu1 %v354_v19 }
  0x3f   :  { %359 = vmatprep.subr.bf16.mxu0 %v358_v22  ;;  %372 = vmatprep.subr.bf16.mxu1 %v358_v22 }
  0x42   :  { %361 = vmatpush3.bf16.msra.mxu0 %v358_v22  ;;  %380 = vmatpush3.bf16.msra.mxu1 %v358_v22 }
  0x43   :  { %363 = vmatprep.subr.bf16.mxu0 %v362_v25  ;;  %373 = vmatprep.subr.bf16.mxu1 %v362_v25 }
  0x46   :  { %365 = vmatpush3.bf16.msra.mxu0 %v362_v25  ;;  %381 = vmatpush3.bf16.msra.mxu1 %v362_v25 }
  0x49   :  { %323 = vmatmul.mubr.f32.vlgmr.msra.gmra.mrb[0].mxu0 %v41_v26  ;;  %329 = vmatmul.mubr.f32.vlgmr.msra.gmra.mrb[0].mxu1 %v45_v27 }
  0x4a   :  { %325 = vmatprep.mubr.f32.mxu0 %v42_v28  ;;  %331 = vmatprep.mubr.f32.mxu1 %v46_v29 }
  0x4d   :  { %326 = vmatmul.mubr.f32.gmra.mrb[2].mxu0 %v43_v30  ;;  %332 = vmatmul.mubr.f32.gmra.mrb[2].mxu1 %v47_v31 }
 0x11c   :  { %v324_v32 = vpop.f32.mrb[0].mxu0  ;;  %v330_v33 = vpop.f32.mrb[0].mxu1 }
 0x11d   :  { %v130_v34 = vpop.f32.mrb[1].mxu0  ;;  %v150_v35 = vpop.f32.mrb[1].mxu1 }
 0x11e   :  { %v246_v36 = vpack.c.bf16 %v324_v32, %v130_v34  ;;  %v256_v37 = vpack.c.bf16 %v330_v33, %v150_v35 }
 0x120   :  { %247 = vst [vmem:[#allocation7] sm:$0xff] %v246_v36   ;;  %264 = vst [vmem:[#allocation7 + $0x10] sm:$0xff] %v256_v37   ;;  %v327_v38 = vpop.f32.mrb[2].mxu0  ;;  %v333_v39 = vpop.f32.mrb[2].mxu1 }
 0x121   :  { %v140_v40 = vpop.f32.mrb[3].mxu0  ;;  %v160_v41 = vpop.f32.mrb[3].mxu1 }
 0x122   :  { %v251_v42 = vpack.c.bf16 %v327_v38, %v140_v40  ;;  %v261_v43 = vpack.c.bf16 %v333_v39, %v160_v41 }
 0x124   :  { %263 = vst [vmem:[#allocation7 + $0x8] sm:$0xff] %v251_v42   ;;  %265 = vst [vmem:[#allocation7 + $0x18] sm:$0xff] %v261_v43  }
 0x125   :  { %444 = shalt.err (!%p441_p6)
}
 0x126   :  { %s445_s10 = scalar_lea.hbm %s521_s2, 512 }
 0x127   :  { %p446_p7 = scmp.ne.s32.totalorder %s521_s2, %s445_s10  ;;  %p449_p8 = scmp.lt.u32.totalorder %s445_s10, %s521_s2 }
 0x129   :  { %p451_p9 = pnand %p449_p8, %p446_p7 }
 0x12b   :  { %454 = shalt.err (!%p451_p9)
}
 0x12c   :  { %s466_s15 = smov 64   ;;  %s467_s16 = smov 4  }
 0x12d   :  { %220 = dma.vmem_to_hbm [thread:$0]  %s215_s6, 512, %s521_s2, [#allocation4], %s466_s15, %s466_s15, %s467_s16  }
 0x12e   :  { %459 = dma.done.wait [#allocation4], 512  }
 0x12f   :  { %460 = vsyncadd [#allocation4], 4294966784 }
 0x130   :  { %224 = vsyncpa [#allocation3], 1 }
 0x131   :  { %225 = vsyncpa [#allocation6], 1 }
 0x132   :  { %226 = vsyncpa [#allocation4], 1 }

</bundles_post_ra>
